<compile_context>
chip_gen: v7x
topology: tpu7x:2x2x1
jax: 0.10.0
libtpu: 0.0.40
codegen_flags: <defaults>
</compile_context>

<pallas_src>
import functools

import jax
import jax.numpy as jnp
from jax import lax
from jax.experimental import pallas as pl
from jax.experimental.pallas import tpu as pltpu


def _round_up(x, m):
    return ((x + m - 1) // m) * m


def _supcon_kernel(logits_ref, out_ref, acc_ref, *,
                   inv_tau, k_total, tile_k, grid_k):
    """One (row-tile, k-tile) grid step.

    acc_ref is a lane-dense (TILE_N, 128) f32 accumulator holding partial
    per-row sums of exp(logits/tau), zeroed at k == 0.  The last K step does a
    single cross-lane reduce + log and writes log(sum_j exp(logits[i,j]/tau))
    per row.  The l_pos term, the /p and the mean over rows live in the JAX
    wrapper.
    """
    k = pl.program_id(1)
    last_k = grid_k - 1
    n_chunks = tile_k // 128
    tail_start = last_k * tile_k
    tail_needs_mask = (k_total - tail_start) < tile_k   # K % tile_k != 0

    @pl.when(k == 0)
    def _init():
        acc_ref[...] = jnp.zeros_like(acc_ref)

    def _accum(masked):
        base = tail_start if masked else 0   # base only matters when masked
        acc = acc_ref[...]
        for c in range(n_chunks):
            lo = base + c * 128
            if masked and lo >= k_total:
                continue                     # chunk fully in padding -> adds 0
            x = logits_ref[:, c * 128:(c + 1) * 128].astype(jnp.float32) * inv_tau
            if masked and lo + 128 > k_total:
                col = lax.broadcasted_iota(jnp.int32, x.shape, 1)
                x = jnp.where(col < (k_total - lo), x, -jnp.inf)  # exp(-inf)=0
            acc = acc + jnp.exp(x)
        acc_ref[...] = acc

    if tail_needs_mask:
        # Branch-free body on every K tile except the last one; the
        # iota/compare/select masking only runs on the tail tile.
        @pl.when(k != last_k)
        def _body():
            _accum(masked=False)

        @pl.when(k == last_k)
        def _tail():
            _accum(masked=True)
    else:
        _accum(masked=False)

    @pl.when(k == last_k)
    def _finalize():
        # Single XLU cross-lane reduce per row tile, then log and store.
        row_sum = jnp.sum(acc_ref[...], axis=1, keepdims=True)   # [TILE_N, 1]
        out_ref[...] = jnp.log(row_sum)


def supcon_loss(logits, l_pos, p, temperature=0.07, tile_n=512, tile_k=2048):
    """Pallas implementation of SupConLoss.forward(logits, l_pos, p)."""
    N, K = logits.shape
    Np, _ = l_pos.shape
    assert Np == N, "logits and l_pos must have the same number of rows"

    # Tile sizes: sublane multiple of 8 (rows), lane multiple of 128 (cols),
    # clamped so small problems still compile.
    tn = min(tile_n, _round_up(N, 8))
    tk = min(_round_up(tile_k, 128), _round_up(K, 128))

    # v7x megacore: dimension_semantics only shards across the 2 TensorCores if
    # the parallel (row) axis has >= 2 tiles.  Harmless on v5e/v6e.
    if pl.cdiv(N, tn) == 1 and N >= 16:
        tn = max(8, _round_up(pl.cdiv(N, 2), 8))

    grid = (pl.cdiv(N, tn), pl.cdiv(K, tk))      # reduction (K) axis last

    # Scoped VMEM: double-buffered logits tile + lane-dense acc + small out,
    # with headroom; capped at 48 MiB (safe within v7x's 64 MiB physical VMEM).
    tile_bytes = tn * tk * jnp.dtype(logits.dtype).itemsize
    vmem_limit = int(min(48 * 1024 * 1024,
                         max(32 * 1024 * 1024, 3 * tile_bytes + 2 * 1024 * 1024)))

    kernel = functools.partial(
        _supcon_kernel,
        inv_tau=1.0 / float(temperature),
        k_total=K,
        tile_k=tk,
        grid_k=grid[1],
    )

    # per_row_lse[i] = log( sum_j exp(logits[i, j] / tau) )
    per_row_lse = pl.pallas_call(
        kernel,
        out_shape=jax.ShapeDtypeStruct((N, 1), jnp.float32),
        grid_spec=pltpu.PrefetchScalarGridSpec(
            num_scalar_prefetch=0,
            grid=grid,
            in_specs=[
                pl.BlockSpec((tn, tk), lambda i, k: (i, k)),   # logits tile
            ],
            out_specs=pl.BlockSpec((tn, 1), lambda i, k: (i, 0)),
            scratch_shapes=[pltpu.VMEM((tn, 128), jnp.float32)],
        ),
        compiler_params=pltpu.CompilerParams(
            dimension_semantics=("parallel", "arbitrary"),
            vmem_limit_bytes=vmem_limit,
        ),
    )(logits)

    # Hoisted out of the hot path: the tiny l_pos term (N x ~8 elements), the
    # /p and the mean over rows.  Matches the reference exactly:
    # loss = mean( (log(sum exp(logits/tau)) - log(sum exp(l_pos/tau))) / p ).
    lse_pos = jnp.log(
        jnp.sum(jnp.exp(l_pos.astype(jnp.float32) / temperature), axis=1))
    per_row = per_row_lse[:, 0] - lse_pos
    return jnp.mean(per_row) / jnp.asarray(p, jnp.float32)


def _reference(logits, l_pos, p, temperature=0.07):
    l_pos = jnp.exp(l_pos.astype(jnp.float32) / temperature)
    logits = jnp.exp(logits.astype(jnp.float32) / temperature)
    loss = (jnp.log(logits.sum(1)) - jnp.log(l_pos.sum(1))) / p
    return loss.mean()


if __name__ == "__main__":
    key = jax.random.PRNGKey(0)

    # Deterministic cases exercising: single-tile with lane masking, multi
    # row-tile x multi K-tile accumulation, K needing lane masking plus the
    # megacore row split, and the default (big-tile) path.
    #        N     K   Kp   p     tile_n  tile_k
    cases = [
        (8,    32,   8,  8.0,   512,   2048),   # one tile, masked K tail
        (24,  384,   8,  8.0,     8,    128),   # 3 row tiles x 3 K tiles
        (16,  200,   8,  8.0,   512,    128),   # K % 128 != 0 + row split
        (64, 4096,   8,  8.0,   512,   2048),   # defaults: 2 row x 2 K tiles
    ]

    for idx, (N, K, Kp, p, tn, tk) in enumerate(cases):
        k1, k2 = jax.random.split(jax.random.fold_in(key, idx))
        logits = jax.random.normal(k1, (N, K), dtype=jnp.float32)
        l_pos = jax.random.normal(k2, (N, Kp), dtype=jnp.float32)

        out = supcon_loss(logits, l_pos, p, tile_n=tn, tile_k=tk)
        out = jax.block_until_ready(out)
        ref = _reference(logits, l_pos, p)
        assert jnp.allclose(out, ref, rtol=1e-4, atol=1e-5), (idx, out, ref)

    print("KERNEL_OK")
</pallas_src>

<mosaic_0001>
module attributes {stable_mosaic.version = 11 : i64} {
  func.func @_supcon_kernel(%arg0: i32, %arg1: i32, %arg2: memref<8x128xf32, #tpu.memory_space<vmem>>, %arg3: memref<8x1xf32, #tpu.memory_space<vmem>>, %arg4: memref<8x128xf32, #tpu.memory_space<vmem>>) attributes {dimension_semantics = [#tpu.dimension_semantics<parallel>, #tpu.dimension_semantics<arbitrary>], iteration_bounds = array<i64: 1, 1>, scalar_prefetch = 0 : i64, scratch_operands = 1 : i64, tpu.core_type = #tpu.core_type<tc>, window_params = [{transform_indices = @transform_0, window_bounds = array<i64: 8, 128>}, {transform_indices = @transform_1, window_bounds = array<i64: 8, 1>}]} {
    %c0_i32 = arith.constant 0 : i32
    %0 = arith.cmpi eq, %arg1, %c0_i32 : i32
    %1 = arith.extui %0 : i1 to i32
    %c0_i32_0 = arith.constant 0 : i32
    %2 = arith.cmpi ne, %1, %c0_i32_0 : i32
    scf.if %2 {
      %cst = arith.constant 0.000000e+00 : f32
      %12 = vector.broadcast %cst : f32 to vector<8x128xf32>
      %c0 = arith.constant 0 : index
      %c0_7 = arith.constant 0 : index
      %13 = vector.load %arg4[%c0, %c0_7] : memref<8x128xf32, #tpu.memory_space<vmem>>, vector<8x128xf32>
      tpu.vector_store %arg4[%c0, %c0_7], %12 {strides = array<i32>} : memref<8x128xf32, #tpu.memory_space<vmem>>, vector<8x128xf32>,
    } else {
    }
    %c0_i32_1 = arith.constant 0 : i32
    %3 = arith.cmpi ne, %arg1, %c0_i32_1 : i32
    %4 = arith.extui %3 : i1 to i32
    %c0_i32_2 = arith.constant 0 : i32
    %5 = arith.cmpi ne, %4, %c0_i32_2 : i32
    scf.if %5 {
      %c0 = arith.constant 0 : index
      %c0_7 = arith.constant 0 : index
      %12 = vector.load %arg4[%c0, %c0_7] : memref<8x128xf32, #tpu.memory_space<vmem>>, vector<8x128xf32>
      %c0_8 = arith.constant 0 : index
      %c0_9 = arith.constant 0 : index
      %13 = vector.load %arg2[%c0_8, %c0_9] : memref<8x128xf32, #tpu.memory_space<vmem>>, vector<8x128xf32>
      %cst = arith.constant 14.2857141 : f32
      %14 = vector.broadcast %cst : f32 to vector<8x128xf32>
      %15 = arith.mulf %13, %14 : vector<8x128xf32>
      %16 = math.exp %15 : vector<8x128xf32>
      %17 = arith.addf %12, %16 : vector<8x128xf32>
      %c0_10 = arith.constant 0 : index
      %c0_11 = arith.constant 0 : index
      %18 = vector.load %arg4[%c0_10, %c0_11] : memref<8x128xf32, #tpu.memory_space<vmem>>, vector<8x128xf32>
      tpu.vector_store %arg4[%c0_10, %c0_11], %17 {strides = array<i32>} : memref<8x128xf32, #tpu.memory_space<vmem>>, vector<8x128xf32>,
    } else {
    }
    %c0_i32_3 = arith.constant 0 : i32
    %6 = arith.cmpi eq, %arg1, %c0_i32_3 : i32
    %7 = arith.extui %6 : i1 to i32
    %c0_i32_4 = arith.constant 0 : i32
    %8 = arith.cmpi ne, %7, %c0_i32_4 : i32
    scf.if %8 {
      %c0 = arith.constant 0 : index
      %c0_7 = arith.constant 0 : index
      %12 = vector.load %arg4[%c0, %c0_7] : memref<8x128xf32, #tpu.memory_space<vmem>>, vector<8x128xf32>
      %c0_8 = arith.constant 0 : index
      %c0_9 = arith.constant 0 : index
      %13 = vector.load %arg2[%c0_8, %c0_9] : memref<8x128xf32, #tpu.memory_space<vmem>>, vector<8x128xf32>
      %cst = arith.constant 14.2857141 : f32
      %14 = vector.broadcast %cst : f32 to vector<8x128xf32>
      %15 = arith.mulf %13, %14 : vector<8x128xf32>
      %16 = tpu.iota {dimensions = array<i32: 1>} : vector<8x128xi32>
      %c32_i32 = arith.constant 32 : i32
      %17 = vector.broadcast %c32_i32 : i32 to vector<8x128xi32>
      %18 = arith.cmpi slt, %16, %17 : vector<8x128xi32>
      %cst_10 = arith.constant 0xFF800000 : f32
      %19 = vector.broadcast %cst_10 : f32 to vector<8x128xf32>
      %20 = arith.select %18, %15, %19 : vector<8x128xi1>, vector<8x128xf32>
      %21 = math.exp %20 : vector<8x128xf32>
      %22 = arith.addf %12, %21 : vector<8x128xf32>
      %c0_11 = arith.constant 0 : index
      %c0_12 = arith.constant 0 : index
      %23 = vector.load %arg4[%c0_11, %c0_12] : memref<8x128xf32, #tpu.memory_space<vmem>>, vector<8x128xf32>
      tpu.vector_store %arg4[%c0_11, %c0_12], %22 {strides = array<i32>} : memref<8x128xf32, #tpu.memory_space<vmem>>, vector<8x128xf32>,
    } else {
    }
    %c0_i32_5 = arith.constant 0 : i32
    %9 = arith.cmpi eq, %arg1, %c0_i32_5 : i32
    %10 = arith.extui %9 : i1 to i32
    %c0_i32_6 = arith.constant 0 : i32
    %11 = arith.cmpi ne, %10, %c0_i32_6 : i32
    scf.if %11 {
      %c0 = arith.constant 0 : index
      %c0_7 = arith.constant 0 : index
      %12 = vector.load %arg4[%c0, %c0_7] : memref<8x128xf32, #tpu.memory_space<vmem>>, vector<8x128xf32>
      %cst = arith.constant dense<0.000000e+00> : vector<8xf32>
      %13 = vector.multi_reduction <add>, %12, %cst [1] : vector<8x128xf32> to vector<8xf32>
      %14 = vector.shape_cast %13 : vector<8xf32> to vector<8x1xf32>
      %15 = math.log %14 : vector<8x1xf32>
      %c0_8 = arith.constant 0 : index
      %c0_9 = arith.constant 0 : index
      %16 = vector.load %arg3[%c0_8, %c0_9] : memref<8x1xf32, #tpu.memory_space<vmem>>, vector<8x1xf32>
      tpu.vector_store %arg3[%c0_8, %c0_9], %15 {strides = array<i32>} : memref<8x1xf32, #tpu.memory_space<vmem>>, vector<8x1xf32>,
    } else {
    }
    return
  }
  func.func @transform_0(%arg0: i32, %arg1: i32) -> (i32, i32) {
    %c0_i32 = arith.constant 0 : i32
    return %arg0, %arg1 : i32, i32
  }
  func.func @transform_1(%arg0: i32, %arg1: i32) -> (i32, i32) {
    %c0_i32 = arith.constant 0 : i32
    %c0_i32_0 = arith.constant 0 : i32
    return %arg0, %c0_i32 : i32, i32
  }
}

</mosaic_0001>

<bundles_post_ra>
// kernel: tpu_custom_call.1
= control target key start
LH: loop header
LB: loop body
LE: loop exit
PB: predicated region body
PF: predicated region fallthrough
CT: control target
= control target key end

     0   :  { %6 = vsyncpa [#allocation4], 0  ;;  %s91_s6 = smov [#allocation3]   ;;  %s117_s0 = inlined_call_operand.hbm [shape: f32[8,32], index: 0, kind: input, shape index: {}]   ;;  %s118_s1 = inlined_call_operand.vmem [shape: f32[8,1], index: 1, kind: output, shape index: {}]  }
   0x1   :  { %s13_s7 = sshll.u32 %s91_s6, 4  ;;  %s67_s10 = scalar_lea.hbm %s117_s0, 128  ;;  %s14_s7 = int_to_ptr.vmem [resolvable:$true] %s13_s7 }
   0x2   :  { %p68_p0 = scmp.ne.s32.totalorder %s117_s0, %s67_s10  ;;  %p71_p1 = scmp.lt.u32.totalorder %s67_s10, %s117_s0 }
   0x4   :  { %p73_p2 = pnand %p71_p1, %p68_p0 }
   0x6   :  { %76 = shalt.err (!%p73_p2)
}
   0x7   :  { %s77_s15 = scalar_lea.vmem %s14_s7, 128  ;;  %p82_p4 = scmp.lt.s32.totalorder %s14_s7, %s14_s7 }
   0x8   :  { %p78_p3 = scmp.ne.s32.totalorder %s14_s7, %s77_s15  ;;  %p83_p5 = scmp.lt.s32.totalorder %s77_s15, %s77_s15 }
   0xa   :  { %p84_p6 = por %p83_p5, %p82_p4 }
   0xc   :  { %p85_p7 = pnand %p84_p6, %p78_p3 }
   0xe   :  { %88 = shalt.err (!%p85_p7)
}
   0xf   :  { %16 = dma.hbm_to_vmem [thread:$0]  %s117_s0, 128, %s14_s7, [#allocation4]  }
  0x10   :  { %89 = dma.done.wait [#allocation4], 128  }
  0x11   :  { %90 = vsyncadd [#allocation4], 4294967168  ;;  %v42_v0 = vlaneseq  ;;  %v40_v2 = vld [vmem:[#allocation3] sm:$0xff]  ;;  %vm55_vm1 = vcmask 7168  }
  0x12   :  { %v41_v3 = vmul.f32 14.285714, %v40_v2 }
  0x13   :  { %v43_v1 = vand.u32 127, %v42_v0 }
  0x15   :  { %vm44_vm0 = vcmp.lt.s32.totalorder %v43_v1, 32 }
  0x16   :  { %v45_v4 = vsel %vm44_vm0, %v41_v3, -inf }
  0x17   :  { %v46_v5 = vmul.f32 1.442695, %v45_v4 }
  0x19   :  { %63 = vpow2.f32 %v46_v5 }
  0x23   :  { %v64_v6 = vpop.eup %63 }
  0x24   :  { %51 = vadd.xlane.f32.xlu0 %v64_v6 }
  0xb1   :  { %v52_v7 = vpop.xlane.xlu0 %51 }
  0xb2   :  { %65 = vlog2.f32 %v52_v7 }
  0xbc   :  { %v66_v8 = vpop.eup %65 }
  0xbd   :  { %v54_v9 = vmul.f32 0.6931472, %v66_v8 }
  0xbf   :  { %56 = vst.msk [vmem:[%s118_s1] sm:$0xff] %vm55_vm1, %v54_v9 }
  0xc0   :  { %61 = vsyncpa [#allocation4], 1 }

</bundles_post_ra>
